<compile_context>
chip_gen: v5e
topology: v5e:2x2
jax: 0.10.0
libtpu: 0.0.40
codegen_flags: <defaults>
</compile_context>

<pallas_src>
import functools

import jax
import jax.numpy as jnp
from jax.experimental import pallas as pl
from jax.experimental.pallas import tpu as pltpu

# ----------------------------- config ---------------------------------------
INPUT_DIM = 32
HIDDEN_DIMS = (64, 64)
OUTPUT_DIM = 32
USE_LAYER_NORM = True
LN_EPS = 1e-5
NUM_AGENTS = 8          # small test batch (== num_agents in the Encoder)

LANE = 128              # pad hidden feature axes to the TPU lane width
SUBLANE = 8             # f32 sublane granularity for the batch axis
DEFAULT_TB = 512        # rows per grid step; sweep {512, 1024} for large B

# TODO(synk): encoder_config.lstm_cell (nn.LSTMCell state carry) and the
# optional message_encoder MLP are disabled in this config; only the
# obs_encoder MLP path of Encoder.forward is implemented here.


def _round_up(x, m):
    return (x + m - 1) // m * m


def _pad2d(a, rows, cols, value=0.0):
    return jnp.pad(a, ((0, rows - a.shape[0]), (0, cols - a.shape[1])),
                   constant_values=value)


# ----------------------------- kernel ---------------------------------------
def _mlp_kernel(x_ref, w1_ref, b1_ref, w2_ref, b2_ref, w3_ref, b3_ref,
                gamma_ref, beta_ref, o_ref, *, use_layer_norm):
    # x tile: (tb, d_in) f32 straight from HBM; bf16 cast happens in VMEM.
    x = x_ref[...].astype(jnp.bfloat16)

    # Layer 1: bf16 MXU matmul, f32 accumulation; bias + ReLU in f32.
    h = jnp.dot(x, w1_ref[...], preferred_element_type=jnp.float32)
    h = jnp.maximum(h + b1_ref[...], 0.0)

    # Layer 2.
    h = jnp.dot(h.astype(jnp.bfloat16), w2_ref[...],
                preferred_element_type=jnp.float32)
    h = jnp.maximum(h + b2_ref[...], 0.0)

    # Output layer: (tb, 128) @ (128, d_out) -> (tb, d_out); all lanes real.
    y = jnp.dot(h.astype(jnp.bfloat16), w3_ref[...],
                preferred_element_type=jnp.float32)
    y = y + b3_ref[...]

    if use_layer_norm:
        # No masking needed: w3/b3 are unpadded along the output axis, so
        # every lane of y is a real feature.
        mean = jnp.mean(y, axis=-1, keepdims=True)
        centered = y - mean
        var = jnp.mean(centered * centered, axis=-1, keepdims=True)
        y = centered * jax.lax.rsqrt(var + LN_EPS)          # EUP rsqrt
        y = y * gamma_ref[...] + beta_ref[...]

    o_ref[...] = y.astype(o_ref.dtype)


# ----------------------------- params prep (one-time) ------------------------
def prepare_params(params):
    """Pad + bf16-cast parameters ONCE (hoisted out of the per-forward path)."""
    w1, b1, w2, b2, w3, b3, gamma, beta = params
    d_in, d_h1 = w1.shape
    d_h2 = w2.shape[1]
    d_out = w3.shape[1]
    p_h1, p_h2 = _round_up(d_h1, LANE), _round_up(d_h2, LANE)
    return (
        _pad2d(w1, d_in, p_h1).astype(jnp.bfloat16),   # (d_in, 128)
        _pad2d(b1, 1, p_h1),                           # (1, 128)  f32
        _pad2d(w2, p_h1, p_h2).astype(jnp.bfloat16),   # (128, 128)
        _pad2d(b2, 1, p_h2),                           # (1, 128)  f32
        _pad2d(w3, p_h2, d_out).astype(jnp.bfloat16),  # (128, d_out)
        b3.astype(jnp.float32),                        # (1, d_out)
        gamma.astype(jnp.float32),                     # (1, d_out)
        beta.astype(jnp.float32),                      # (1, d_out)
    )


# ----------------------------- wrapper ---------------------------------------
def mlp_forward(x, prepared_params, *, tb=DEFAULT_TB,
                use_layer_norm=USE_LAYER_NORM):
    """Fused MLP forward.  x: (B, d_in) f32.  Returns (B, d_out) f32."""
    w1, b1, w2, b2, w3, b3, gamma, beta = prepared_params
    B, d_in = x.shape
    d_out = w3.shape[1]

    # Batch tile: sublane multiple, clamped to the (rounded-up) batch.
    tb = max(SUBLANE, min(tb, _round_up(B, SUBLANE)))
    grid = (pl.cdiv(B, tb),)   # ragged last block is clipped by Pallas

    def const_spec(shape):
        # Constant-index full block: stays resident in VMEM across grid steps.
        return pl.BlockSpec(shape, lambda i: (0,) * len(shape))

    return pl.pallas_call(
        functools.partial(_mlp_kernel, use_layer_norm=use_layer_norm),
        out_shape=jax.ShapeDtypeStruct((B, d_out), jnp.float32),
        grid=grid,
        in_specs=[
            pl.BlockSpec((tb, d_in), lambda i: (i, 0)),   # x: tiled over batch
            const_spec(w1.shape), const_spec(b1.shape),
            const_spec(w2.shape), const_spec(b2.shape),
            const_spec(w3.shape), const_spec(b3.shape),
            const_spec(gamma.shape), const_spec(beta.shape),
        ],
        out_specs=pl.BlockSpec((tb, d_out), lambda i: (i, 0)),
        compiler_params=pltpu.CompilerParams(
            dimension_semantics=("parallel",)),   # shards steps across TCs
    )(x, w1, b1, w2, b2, w3, b3, gamma, beta)


def encoder_forward(x, prepared_params):
    """Encoder.forward with lstm_cell=None, message_encoder=None."""
    return mlp_forward(x, prepared_params)


# ----------------------------- params / reference ----------------------------
def init_params(key):
    """Deterministic synthetic parameters (PyTorch Linear-like uniform init)."""
    dims = [INPUT_DIM, *HIDDEN_DIMS, OUTPUT_DIM]
    keys = jax.random.split(key, 2 * (len(dims) - 1))
    params = []
    for i in range(len(dims) - 1):
        fan_in, fan_out = dims[i], dims[i + 1]
        bound = 1.0 / jnp.sqrt(fan_in)
        w = jax.random.uniform(keys[2 * i], (fan_in, fan_out),
                               minval=-bound, maxval=bound, dtype=jnp.float32)
        b = jax.random.uniform(keys[2 * i + 1], (1, fan_out),
                               minval=-bound, maxval=bound, dtype=jnp.float32)
        params += [w, b]
    gamma = jnp.ones((1, OUTPUT_DIM), jnp.float32)
    beta = jnp.zeros((1, OUTPUT_DIM), jnp.float32)
    params += [gamma, beta]
    return tuple(params)


def mlp_reference(x, params, *, match_kernel_dtypes=True):
    """Plain-JAX reference.  match_kernel_dtypes mirrors the bf16 MXU operands."""
    w1, b1, w2, b2, w3, b3, gamma, beta = params
    cast = (lambda a: a.astype(jnp.bfloat16)) if match_kernel_dtypes else (lambda a: a)
    h = jnp.maximum(jnp.dot(cast(x), cast(w1),
                            preferred_element_type=jnp.float32) + b1, 0.0)
    h = jnp.maximum(jnp.dot(cast(h), cast(w2),
                            preferred_element_type=jnp.float32) + b2, 0.0)
    y = jnp.dot(cast(h), cast(w3), preferred_element_type=jnp.float32) + b3
    mean = jnp.mean(y, axis=-1, keepdims=True)
    var = jnp.mean((y - mean) ** 2, axis=-1, keepdims=True)
    y = (y - mean) * jax.lax.rsqrt(var + LN_EPS)
    return y * gamma + beta


# ----------------------------- test ------------------------------------------
if __name__ == "__main__":
    key = jax.random.PRNGKey(0)
    k_x, k_p, k_x2 = jax.random.split(key, 3)
    params = init_params(k_p)
    prepared = prepare_params(params)   # one-time pad + bf16 cast

    # Small Encoder-shaped test: num_agents x input_dim.
    x = jax.random.normal(k_x, (NUM_AGENTS, INPUT_DIM), dtype=jnp.float32)
    out = jax.block_until_ready(encoder_forward(x, prepared))
    assert out.shape == (NUM_AGENTS, OUTPUT_DIM)

    ref_bf16 = mlp_reference(x, params, match_kernel_dtypes=True)
    ref_f32 = mlp_reference(x, params, match_kernel_dtypes=False)
    assert jnp.allclose(out, ref_bf16, atol=2e-3, rtol=2e-3), \
        "mismatch vs bf16-matched reference"
    assert jnp.allclose(out, ref_f32, atol=1e-1), \
        "mismatch vs f32 reference (sanity)"

    # Multi-step grid check: non-multiple batch exercises the clipped last
    # block plus multi-step batch tiling (grid = (4,)).
    x2 = jax.random.normal(k_x2, (200, INPUT_DIM), dtype=jnp.float32)
    out2 = jax.block_until_ready(mlp_forward(x2, prepared, tb=64))
    ref2 = mlp_reference(x2, params, match_kernel_dtypes=True)
    assert out2.shape == (200, OUTPUT_DIM)
    assert jnp.allclose(out2, ref2, atol=2e-3, rtol=2e-3), \
        "mismatch vs reference (tiled batch)"

    print("KERNEL_OK")
</pallas_src>

<mosaic_0001>
module attributes {stable_mosaic.version = 11 : i64} {
  func.func @_mlp_kernel(%arg0: i32, %arg1: memref<8x32xf32, #tpu.memory_space<vmem>>, %arg2: memref<32x128xbf16, #tpu.memory_space<vmem>>, %arg3: memref<1x128xf32, #tpu.memory_space<vmem>>, %arg4: memref<128x128xbf16, #tpu.memory_space<vmem>>, %arg5: memref<1x128xf32, #tpu.memory_space<vmem>>, %arg6: memref<128x32xbf16, #tpu.memory_space<vmem>>, %arg7: memref<1x32xf32, #tpu.memory_space<vmem>>, %arg8: memref<1x32xf32, #tpu.memory_space<vmem>>, %arg9: memref<1x32xf32, #tpu.memory_space<vmem>>, %arg10: memref<8x32xf32, #tpu.memory_space<vmem>>) attributes {dimension_semantics = [#tpu.dimension_semantics<parallel>], iteration_bounds = array<i64: 1>, scalar_prefetch = 0 : i64, scratch_operands = 0 : i64, tpu.core_type = #tpu.core_type<tc>, window_params = [{transform_indices = @transform_0, window_bounds = array<i64: 8, 32>}, {pipeline_mode = #tpu.pipeline_mode<synchronous>, transform_indices = @transform_1, window_bounds = array<i64: 32, 128>}, {pipeline_mode = #tpu.pipeline_mode<synchronous>, transform_indices = @transform_2, window_bounds = array<i64: 1, 128>}, {pipeline_mode = #tpu.pipeline_mode<synchronous>, transform_indices = @transform_3, window_bounds = array<i64: 128, 128>}, {pipeline_mode = #tpu.pipeline_mode<synchronous>, transform_indices = @transform_4, window_bounds = array<i64: 1, 128>}, {pipeline_mode = #tpu.pipeline_mode<synchronous>, transform_indices = @transform_5, window_bounds = array<i64: 128, 32>}, {pipeline_mode = #tpu.pipeline_mode<synchronous>, transform_indices = @transform_6, window_bounds = array<i64: 1, 32>}, {pipeline_mode = #tpu.pipeline_mode<synchronous>, transform_indices = @transform_7, window_bounds = array<i64: 1, 32>}, {pipeline_mode = #tpu.pipeline_mode<synchronous>, transform_indices = @transform_8, window_bounds = array<i64: 1, 32>}, {transform_indices = @transform_9, window_bounds = array<i64: 8, 32>}]} {
    %c0 = arith.constant 0 : index
    %c0_0 = arith.constant 0 : index
    %0 = vector.load %arg1[%c0, %c0_0] : memref<8x32xf32, #tpu.memory_space<vmem>>, vector<8x32xf32>
    %1 = arith.truncf %0 : vector<8x32xf32> to vector<8x32xbf16>
    %c0_1 = arith.constant 0 : index
    %c0_2 = arith.constant 0 : index
    %2 = vector.load %arg2[%c0_1, %c0_2] : memref<32x128xbf16, #tpu.memory_space<vmem>>, vector<32x128xbf16>
    %cst = arith.constant dense<0.000000e+00> : vector<8x128xf32>
    %3 = tpu.matmul %1, %2, %cst {dimension_numbers = #tpu.dot_dimension_numbers<[1], [0], [0], [1], [0, 0, 1, 1], [], []>} : vector<8x32xbf16>, vector<32x128xbf16>, vector<8x128xf32> -> vector<8x128xf32>
    %c0_3 = arith.constant 0 : index
    %c0_4 = arith.constant 0 : index
    %4 = vector.load %arg3[%c0_3, %c0_4] : memref<1x128xf32, #tpu.memory_space<vmem>>, vector<1x128xf32>
    %5 = vector.broadcast %4 : vector<1x128xf32> to vector<8x128xf32>
    %6 = arith.addf %3, %5 : vector<8x128xf32>
    %cst_5 = arith.constant 0.000000e+00 : f32
    %7 = vector.broadcast %cst_5 : f32 to vector<8x128xf32>
    %8 = arith.maximumf %6, %7 : vector<8x128xf32>
    %9 = arith.truncf %8 : vector<8x128xf32> to vector<8x128xbf16>
    %c0_6 = arith.constant 0 : index
    %c0_7 = arith.constant 0 : index
    %10 = vector.load %arg4[%c0_6, %c0_7] : memref<128x128xbf16, #tpu.memory_space<vmem>>, vector<128x128xbf16>
    %cst_8 = arith.constant dense<0.000000e+00> : vector<8x128xf32>
    %11 = tpu.matmul %9, %10, %cst_8 {dimension_numbers = #tpu.dot_dimension_numbers<[1], [0], [0], [1], [0, 0, 1, 1], [], []>} : vector<8x128xbf16>, vector<128x128xbf16>, vector<8x128xf32> -> vector<8x128xf32>
    %c0_9 = arith.constant 0 : index
    %c0_10 = arith.constant 0 : index
    %12 = vector.load %arg5[%c0_9, %c0_10] : memref<1x128xf32, #tpu.memory_space<vmem>>, vector<1x128xf32>
    %13 = vector.broadcast %12 : vector<1x128xf32> to vector<8x128xf32>
    %14 = arith.addf %11, %13 : vector<8x128xf32>
    %cst_11 = arith.constant 0.000000e+00 : f32
    %15 = vector.broadcast %cst_11 : f32 to vector<8x128xf32>
    %16 = arith.maximumf %14, %15 : vector<8x128xf32>
    %17 = arith.truncf %16 : vector<8x128xf32> to vector<8x128xbf16>
    %c0_12 = arith.constant 0 : index
    %c0_13 = arith.constant 0 : index
    %18 = vector.load %arg6[%c0_12, %c0_13] : memref<128x32xbf16, #tpu.memory_space<vmem>>, vector<128x32xbf16>
    %cst_14 = arith.constant dense<0.000000e+00> : vector<8x32xf32>
    %19 = tpu.matmul %17, %18, %cst_14 {dimension_numbers = #tpu.dot_dimension_numbers<[1], [0], [0], [1], [0, 0, 1, 1], [], []>} : vector<8x128xbf16>, vector<128x32xbf16>, vector<8x32xf32> -> vector<8x32xf32>
    %c0_15 = arith.constant 0 : index
    %c0_16 = arith.constant 0 : index
    %20 = vector.load %arg7[%c0_15, %c0_16] : memref<1x32xf32, #tpu.memory_space<vmem>>, vector<1x32xf32>
    %21 = vector.broadcast %20 : vector<1x32xf32> to vector<8x32xf32>
    %22 = arith.addf %19, %21 : vector<8x32xf32>
    %cst_17 = arith.constant dense<0.000000e+00> : vector<8xf32>
    %23 = vector.multi_reduction <add>, %22, %cst_17 [1] : vector<8x32xf32> to vector<8xf32>
    %24 = vector.shape_cast %23 : vector<8xf32> to vector<8x1xf32>
    %cst_18 = arith.constant 3.200000e+01 : f32
    %25 = vector.broadcast %cst_18 : f32 to vector<8x1xf32>
    %26 = arith.divf %24, %25 : vector<8x1xf32>
    %27 = vector.broadcast %26 : vector<8x1xf32> to vector<8x32xf32>
    %28 = arith.subf %22, %27 : vector<8x32xf32>
    %29 = arith.mulf %28, %28 : vector<8x32xf32>
    %cst_19 = arith.constant dense<0.000000e+00> : vector<8xf32>
    %30 = vector.multi_reduction <add>, %29, %cst_19 [1] : vector<8x32xf32> to vector<8xf32>
    %31 = vector.shape_cast %30 : vector<8xf32> to vector<8x1xf32>
    %cst_20 = arith.constant 3.200000e+01 : f32
    %32 = vector.broadcast %cst_20 : f32 to vector<8x1xf32>
    %33 = arith.divf %31, %32 : vector<8x1xf32>
    %cst_21 = arith.constant 9.99999974E-6 : f32
    %34 = vector.broadcast %cst_21 : f32 to vector<8x1xf32>
    %35 = arith.addf %33, %34 : vector<8x1xf32>
    %36 = math.rsqrt %35 : vector<8x1xf32>
    %37 = vector.broadcast %36 : vector<8x1xf32> to vector<8x32xf32>
    %38 = arith.mulf %28, %37 : vector<8x32xf32>
    %c0_22 = arith.constant 0 : index
    %c0_23 = arith.constant 0 : index
    %39 = vector.load %arg8[%c0_22, %c0_23] : memref<1x32xf32, #tpu.memory_space<vmem>>, vector<1x32xf32>
    %40 = vector.broadcast %39 : vector<1x32xf32> to vector<8x32xf32>
    %41 = arith.mulf %38, %40 : vector<8x32xf32>
    %c0_24 = arith.constant 0 : index
    %c0_25 = arith.constant 0 : index
    %42 = vector.load %arg9[%c0_24, %c0_25] : memref<1x32xf32, #tpu.memory_space<vmem>>, vector<1x32xf32>
    %43 = vector.broadcast %42 : vector<1x32xf32> to vector<8x32xf32>
    %44 = arith.addf %41, %43 : vector<8x32xf32>
    %c0_26 = arith.constant 0 : index
    %c0_27 = arith.constant 0 : index
    %45 = vector.load %arg10[%c0_26, %c0_27] : memref<8x32xf32, #tpu.memory_space<vmem>>, vector<8x32xf32>
    tpu.vector_store %arg10[%c0_26, %c0_27], %44 {strides = array<i32>} : memref<8x32xf32, #tpu.memory_space<vmem>>, vector<8x32xf32>,
    return
  }
  func.func @transform_0(%arg0: i32) -> (i32, i32) {
    %c0_i32 = arith.constant 0 : i32
    %c0_i32_0 = arith.constant 0 : i32
    return %arg0, %c0_i32 : i32, i32
  }
  func.func @transform_1(%arg0: i32) -> (i32, i32) {
    %c0_i32 = arith.constant 0 : i32
    %c0_i32_0 = arith.constant 0 : i32
    %c0_i32_1 = arith.constant 0 : i32
    return %c0_i32, %c0_i32_0 : i32, i32
  }
  func.func @transform_2(%arg0: i32) -> (i32, i32) {
    %c0_i32 = arith.constant 0 : i32
    %c0_i32_0 = arith.constant 0 : i32
    %c0_i32_1 = arith.constant 0 : i32
    return %c0_i32, %c0_i32_0 : i32, i32
  }
  func.func @transform_3(%arg0: i32) -> (i32, i32) {
    %c0_i32 = arith.constant 0 : i32
    %c0_i32_0 = arith.constant 0 : i32
    %c0_i32_1 = arith.constant 0 : i32
    return %c0_i32, %c0_i32_0 : i32, i32
  }
  func.func @transform_4(%arg0: i32) -> (i32, i32) {
    %c0_i32 = arith.constant 0 : i32
    %c0_i32_0 = arith.constant 0 : i32
    %c0_i32_1 = arith.constant 0 : i32
    return %c0_i32, %c0_i32_0 : i32, i32
  }
  func.func @transform_5(%arg0: i32) -> (i32, i32) {
    %c0_i32 = arith.constant 0 : i32
    %c0_i32_0 = arith.constant 0 : i32
    %c0_i32_1 = arith.constant 0 : i32
    return %c0_i32, %c0_i32_0 : i32, i32
  }
  func.func @transform_6(%arg0: i32) -> (i32, i32) {
    %c0_i32 = arith.constant 0 : i32
    %c0_i32_0 = arith.constant 0 : i32
    %c0_i32_1 = arith.constant 0 : i32
    return %c0_i32, %c0_i32_0 : i32, i32
  }
  func.func @transform_7(%arg0: i32) -> (i32, i32) {
    %c0_i32 = arith.constant 0 : i32
    %c0_i32_0 = arith.constant 0 : i32
    %c0_i32_1 = arith.constant 0 : i32
    return %c0_i32, %c0_i32_0 : i32, i32
  }
  func.func @transform_8(%arg0: i32) -> (i32, i32) {
    %c0_i32 = arith.constant 0 : i32
    %c0_i32_0 = arith.constant 0 : i32
    %c0_i32_1 = arith.constant 0 : i32
    return %c0_i32, %c0_i32_0 : i32, i32
  }
  func.func @transform_9(%arg0: i32) -> (i32, i32) {
    %c0_i32 = arith.constant 0 : i32
    %c0_i32_0 = arith.constant 0 : i32
    return %arg0, %c0_i32 : i32, i32
  }
}

</mosaic_0001>

<bundles_post_ra>
// kernel: tpu_custom_call.1
= control target key start
LH: loop header
LB: loop body
LE: loop exit
PB: predicated region body
PF: predicated region fallthrough
CT: control target
= control target key end

     0   :  { %14 = vsyncpa [#allocation3], 0  ;;  %s597_s0 = inlined_call_operand.hbm [shape: f32[8,32], index: 0, kind: input, shape index: {}]   ;;  %s598_s1 = inlined_call_operand.vmem [shape: bf16[32,128], index: 1, kind: input, shape index: {}]   ;;  %s599_s2 = inlined_call_operand.vmem [shape: f32[1,128], index: 2, kind: input, shape index: {}]   ;;  %s600_s3 = inlined_call_operand.vmem [shape: bf16[128,128], index: 3, kind: input, shape index: {}]   ;;  %s601_s4 = inlined_call_operand.vmem [shape: f32[1,128], index: 4, kind: input, shape index: {}]   ;;  %s602_s5 = inlined_call_operand.vmem [shape: bf16[128,32], index: 5, kind: input, shape index: {}]   ;;  %s603_s6 = inlined_call_operand.vmem [shape: f32[1,32], index: 6, kind: input, shape index: {}]   ;;  %s604_s7 = inlined_call_operand.vmem [shape: f32[1,32], index: 7, kind: input, shape index: {}]   ;;  %s605_s8 = inlined_call_operand.vmem [shape: f32[1,32], index: 8, kind: input, shape index: {}]   ;;  %s606_s9 = inlined_call_operand.hbm [shape: f32[8,32], index: 9, kind: output, shape index: {}]  }
   0x1   :  { %15 = vsyncpa [#allocation4], 0  ;;  %s21_s11 = sshll.u32 %s597_s0, 4  ;;  %s465_s12 = smov [#allocation2]   ;;  %s22_s11 = int_to_ptr.hbm [resolvable:$true] %s21_s11 }
   0x2   :  { %s23_s13 = sshll.u32 %s465_s12, 4  ;;  %s24_s13 = int_to_ptr.vmem [resolvable:$true] %s23_s13 }
   0x3   :  { %26 = dma.hbm_to_vmem [thread:$0]  %s22_s11, 128, %s24_s13, [#allocation3]  }
   0x4   :  { %461 = dma.done.wait [#allocation3], 128  }
   0x5   :  { %462 = vsyncadd [#allocation3], 4294967168  ;;  %v384_v0 = vld [vmem:[%s598_s1 + $0x8] sm:$0xff]  ;;  %v392_v1 = vld [vmem:[%s600_s3 + $0x38] sm:$0xff]  ;;  %vm70_vm0 = vcmask 261120   ;;  %v466_v37 = vmov 32.0  }
   0x6   :  { %80 = vmatpush.bf16.msra.mxu0 %v384_v0  ;;  %v383_v2 = vld [vmem:[%s598_s1] sm:$0xff]  ;;  %157 = vmatpush.bf16.msra.mxu1 %v392_v1  ;;  %v391_v4 = vld [vmem:[%s600_s3 + $0x30] sm:$0xff]  ;;  %v390_v6 = vld [vmem:[%s600_s3 + $0x28] sm:$0xff]  ;;  %409 = vrcp.f32 %v466_v37  ;;  %s467_s30 = smov [#allocation5]   ;;  %s300_s13 = sshll.u32 %s606_s9, 4  ;;  %s301_s13 = int_to_ptr.hbm [resolvable:$true] %s300_s13 }
   0x7   :  { %v48_v3 = vld [vmem:[#allocation2] sm:$0xff]  ;;  %v388_v8 = vld [vmem:[%s600_s3 + $0x18] sm:$0xff]  ;;  %v387_v9 = vld [vmem:[%s600_s3 + $0x10] sm:$0xff]  ;;  %s298_s10 = sshll.u32 %s467_s30, 4  ;;  %s299_s10 = int_to_ptr.vmem [resolvable:$true] %s298_s10 }
   0x8   :  { %v49_v5 = vpack.c.bf16 %v48_v3, %v48_v3  ;;  %v389_v7 = vld [vmem:[%s600_s3 + $0x20] sm:$0xff]  ;;  %v386_v10 = vld [vmem:[%s600_s3 + $0x8] sm:$0xff]  ;;  %v400_v12 = vld [vmem:[%s602_s5 + $0x38] sm:$0xff] }
   0x9   :  { %v385_v11 = vld [vmem:[%s600_s3] sm:$0xff]  ;;  %240 = vmatpush.bf16.msra.mxu2 %v400_v12  ;;  %v399_v13 = vld [vmem:[%s602_s5 + $0x30] sm:$0xff]  ;;  %v398_v14 = vld [vmem:[%s602_s5 + $0x28] sm:$0xff] }
   0xa   :  { %81 = vmatpush.bf16.msra.mxu0 %v383_v2  ;;  %158 = vmatpush.bf16.msra.mxu1 %v391_v4  ;;  %v397_v15 = vld [vmem:[%s602_s5 + $0x20] sm:$0xff]  ;;  %v396_v16 = vld [vmem:[%s602_s5 + $0x18] sm:$0xff]  ;;  %v395_v17 = vld [vmem:[%s602_s5 + $0x10] sm:$0xff] }
   0xb   :  { %v404_v18 = vld [vmem:[%s599_s2] ss:$0 sm:$0xff]  ;;  %v394_v24 = vld [vmem:[%s602_s5 + $0x8] sm:$0xff] }
   0xc   :  { %v393_v25 = vld [vmem:[%s602_s5] sm:$0xff]  ;;  %v410_v38 = vpop.eup %409 }
   0xd   :  { %318 = vmatmul.msk.bf16.vlgmr.msra.gmra.mxu0 %vm70_vm0, %v49_v5  ;;  %241 = vmatpush.bf16.msra.mxu2 %v399_v13  ;;  %v405_v26 = vld [vmem:[%s601_s4] ss:$0 sm:$0xff]  ;;  %v257_v39 = vmul.f32 32.0, %v410_v38  ;;  %vm261_vm1 = vweird.f32 %v410_v38 }
   0xe   :  { %159 = vmatpush.bf16.msra.mxu1 %v390_v6  ;;  %v406_v32 = vld [vmem:[%s603_s6] ss:$0 sm:$0xff] }
   0xf   :  { %v258_v40 = vsub.f32 1.0, %v257_v39  ;;  %v407_v58 = vld [vmem:[%s604_s7] ss:$0 sm:$0xff] }
  0x10   :  { %v408_v61 = vld [vmem:[%s605_s8] ss:$0 sm:$0xff] }
  0x11   :  { %242 = vmatpush.bf16.msra.mxu2 %v398_v14  ;;  %v259_v41 = vmul.f32 %v410_v38, %v258_v40 }
  0x12   :  { %160 = vmatpush.bf16.msra.mxu1 %v389_v7 }
  0x13   :  { %v260_v42 = vadd.f32 %v410_v38, %v259_v41 }
  0x15   :  { %243 = vmatpush.bf16.msra.mxu2 %v397_v15  ;;  %v262_v43 = vsel %vm261_vm1, %v410_v38, %v260_v42 }
  0x16   :  { %161 = vmatpush.bf16.msra.mxu1 %v388_v8 }
  0x19   :  { %244 = vmatpush.bf16.msra.mxu2 %v396_v16 }
  0x1a   :  { %162 = vmatpush.bf16.msra.mxu1 %v387_v9 }
  0x1d   :  { %245 = vmatpush.bf16.msra.mxu2 %v395_v17 }
  0x1e   :  { %163 = vmatpush.bf16.msra.mxu1 %v386_v10 }
  0x21   :  { %246 = vmatpush.bf16.msra.mxu2 %v394_v24 }
  0x22   :  { %164 = vmatpush.bf16.msra.mxu1 %v385_v11 }
  0x25   :  { %247 = vmatpush.bf16.msra.mxu2 %v393_v25 }
  0x8a   :  { %v83_v19 = vpop.f32.mrf.mxu0 }
  0x8b   :  { %v84_v20 = vadd.f32 %v404_v18, %v83_v19 }
  0x8d   :  { %v87_v21 = vmax.f32 %v84_v20, 0.0 }
  0x8f   :  { %v88_v22 = vpack.c.bf16 %v87_v21, %v87_v21 }
  0x91   :  { %165 = vmatmul.bf16.vlgmr.msra.gmra.mxu1 %v88_v22 }
  0x92   :  { %v85_v23 = vpop.f32.mrf.mxu0 }
 0x10e   :  { %v166_v27 = vpop.f32.mrf.mxu1 }
 0x10f   :  { %v167_v28 = vadd.f32 %v405_v26, %v166_v27 }
 0x111   :  { %v170_v29 = vmax.f32 %v167_v28, 0.0 }
 0x113   :  { %v171_v30 = vpack.c.bf16 %v170_v29, %v170_v29 }
 0x115   :  { %248 = vmatmul.bf16.vlgmr.msra.gmra.mxu2 %v171_v30 }
 0x116   :  { %v168_v31 = vpop.f32.mrf.mxu1 }
 0x198   :  { %v249_v33 = vpop.f32.mrf.mxu2 }
 0x199   :  { %v250_v34 = vadd.f32 %v406_v32, %v249_v33 }
 0x19b   :  { %v253_v35 = vsel %vm70_vm0, %v250_v34, 0.0 }
 0x19c   :  { %254 = vadd.xlane.f32.xlu0 %v253_v35 }
 0x1a0   :  { %v251_v36 = vpop.f32.mrf.mxu2 }
 0x20f   :  { %v255_v44 = vpop.xlane.xlu0 %254 }
 0x210   :  { %v263_v45 = vmul.f32 %v262_v43, %v255_v44 }
 0x212   :  { %v264_v46 = vsub.f32 %v250_v34, %v263_v45 }
 0x214   :  { %v265_v47 = vmul.f32 %v264_v46, %v264_v46 }
 0x216   :  { %v266_v48 = vsel %vm70_vm0, %v265_v47, 0.0 }
 0x217   :  { %267 = vadd.xlane.f32.xlu0 %v266_v48 }
 0x28a   :  { %v268_v49 = vpop.xlane.xlu0 %267 }
 0x28b   :  { %v269_v50 = vmul.f32 %v268_v49, %v262_v43 }
 0x28d   :  { %v270_v51 = vadd.f32 1e-05, %v269_v50 }
 0x28f   :  { %411 = vrsqrt.f32 %v270_v51  ;;  %vm277_vm3 = vweird.f32 %v270_v51 }
 0x295   :  { %v412_v52 = vpop.eup %411 }
 0x296   :  { %v272_v53 = vmul.f32 %v412_v52, %v270_v51  ;;  %vm278_vm2 = vweird.f32 %v412_v52 }
 0x297   :  { %vm279_vm4 = vmor %vm277_vm3, %vm278_vm2 }
 0x298   :  { %v273_v54 = vmul.f32 %v412_v52, %v272_v53 }
 0x29a   :  { %v274_v55 = vmul.f32 0.5, %v273_v54 }
 0x29c   :  { %v275_v56 = vsub.f32 1.5, %v274_v55 }
 0x29e   :  { %v276_v57 = vmul.f32 %v412_v52, %v275_v56 }
 0x2a0   :  { %v280_v59 = vsel %vm279_vm4, %v412_v52, %v276_v57 }
 0x2a1   :  { %v281_v60 = vmul.f32 %v280_v59, %v264_v46 }
 0x2a3   :  { %v286_v62 = vmul.f32 %v407_v58, %v281_v60 }
 0x2a5   :  { %v291_v63 = vadd.f32 %v408_v61, %v286_v62 }
 0x2a7   :  { %292 = vst.msk [vmem:[#allocation5] sm:$0xff] %vm70_vm0, %v291_v63 }
 0x2a8   :  { %303 = dma.vmem_to_hbm [thread:$0]  %s299_s10, 128, %s301_s13, [#allocation4]  }
 0x2a9   :  { %463 = dma.done.wait [#allocation4], 128  }
 0x2aa   :  { %464 = vsyncadd [#allocation4], 4294967168 }
 0x2ab   :  { %308 = vsyncpa [#allocation3], 1 }
 0x2ac   :  { %309 = vsyncpa [#allocation4], 1 }

</bundles_post_ra>
